<compile_context>
chip_gen: v6e
topology: v6e:2x2x1
jax: 0.10.0
libtpu: 0.0.40
codegen_flags: <defaults>
</compile_context>

<pallas_src>
import functools

import jax
import jax.numpy as jnp
from jax.experimental import pallas as pl
from jax.experimental.pallas import tpu as pltpu


def _score_kernel(qT_ref, a_ref, bu_ref, out_ref):
    """One tile of samples: q^T [D, TN] -> probabilities [1, TN]."""
    qT = qT_ref[...]                                   # [D, TN]  (f32)
    D, tn = qT.shape
    S = bu_ref.shape[0]

    # Single fused MXU matmul over the resident weight slab:
    #   rows [0, S*D)    : Wt[s*D+e, d] = W[s, d, e]  ->  aq[s*D+e, n] = (q_n @ W_s)[e]
    #   rows [S*D, S*D+S): V[s, d]                     ->  aq[S*D+s, n] = (V q_n)[s]
    aq = jnp.dot(a_ref[...], qT, preferred_element_type=jnp.float32)   # [S*D + S, TN]

    qW = aq[:S * D].reshape(S, D, tn)                  # [S, D, TN]  (slice boundary S*D is
    lin = aq[S * D:]                                   # [S, TN]      8-aligned when D % 8 == 0)

    # Remaining bilinear contraction over D: exact-f32 VPU multiply + sublane reduce.
    bil = jnp.sum(qW * qT[None, :, :], axis=1)         # [S, TN]

    z = jnp.tanh(bil + lin + bu_ref[:, 0:1])           # [S, TN]   (bias column broadcast)

    # Final u-contraction (S small) on the VPU; avoids a 1-wide MXU matmul / narrow vregs.
    score = jnp.sum(z * bu_ref[:, 1:2], axis=0, keepdims=True)        # [1, TN]
    out_ref[...] = jax.nn.sigmoid(score)


def posterior_probs(qT, A, bu, *, max_tile_n=512):
    """sigmoid(u @ tanh(q W q + V q + b)) for every column of qT [D, N] -> [N]."""
    D, N = qT.shape
    S = bu.shape[0]
    assert A.shape == (S * D + S, D)
    assert max_tile_n % 128 == 0, "max_tile_n must be a multiple of 128 (lane-dense blocks)"

    # Pad the sample axis only up to a lane-dense multiple of 128; pick the tile adaptively
    # so tiny relations don't pay for a full 512-wide tile.
    Np = max(128, ((N + 127) // 128) * 128)
    tile_n = min(max_tile_n, Np)
    grid_n = pl.cdiv(Np, tile_n)
    Np = grid_n * tile_n
    n_pad = Np - N
    qT_p = jnp.pad(qT, ((0, 0), (0, n_pad))) if n_pad else qT

    out = pl.pallas_call(
        _score_kernel,
        out_shape=jax.ShapeDtypeStruct((1, Np), jnp.float32),
        grid=(grid_n,),
        in_specs=[
            pl.BlockSpec((D, tile_n), lambda i: (0, i)),        # q^T tile (N on lanes)
            pl.BlockSpec((S * D + S, D), lambda i: (0, 0)),     # fused [Wt ; V] weights (resident)
            pl.BlockSpec((S, 2), lambda i: (0, 0)),             # [b | u] columns (resident)
        ],
        out_specs=pl.BlockSpec((1, tile_n), lambda i: (0, i)),  # lane-dense output
        compiler_params=pltpu.CompilerParams(
            dimension_semantics=("parallel",)),
        # TODO(synk): for very large D (>~1K), K-tile the [S*D+S, D] weight block along D
        # (extra "arbitrary" grid axis + f32 accumulator) and set vmem_limit_bytes for v7x.
    )(qT_p, A, bu)
    return out[0, :N]


@functools.partial(jax.jit, static_argnames=("max_tile_n",))
def _score_pairs(node_embeds, pairs, A, bu, *, max_tile_n=512):
    """Gather + concat (XLA glue) staged together with the kernel under one jit."""
    # TODO(synk): fuse this gather into the kernel (scalar-prefetched pair indices +
    # VMEM-resident node_embeds) to drop the q round trip through HBM.
    qT = jnp.concatenate(
        [node_embeds[pairs[:, 0]], node_embeds[pairs[:, 1]]], axis=1).T    # [D, N]
    return posterior_probs(qT, A, bu, max_tile_n=max_tile_n)


def _ref_probs(q, W, V, b, u):
    """Pure-JAX reference of the same math (nn.Bilinear(q,q) + nn.Linear(q), u, sigmoid).

    Staged the same way as the kernel (MXU matmul + exact-f32 elementwise reduce) so the
    comparison is robust to TPU's default bf16-pass matmul rounding.
    """
    qW = jnp.einsum('nd,sde->nse', q, W)                   # [N, S, D]
    bil = jnp.sum(qW * q[:, None, :], axis=-1)             # [N, S] == einsum('nd,sde,ne->ns')
    lin = q @ V.T                                          # [N, S]
    z = jnp.tanh(bil + lin + b[None, :])
    return jax.nn.sigmoid(jnp.sum(z * u[:, 0][None, :], axis=-1))


class FactorizedPosteriorPallas:
    """load_method == 1 parameterization; forward == fast_inference_mode path."""

    def __init__(self, num_rels, latent_dim, num_args_per_rel, slice_dim=5, key=None):
        self.num_rels = num_rels
        self.latent_dim = latent_dim
        self.slice_dim = slice_dim
        self.rel2idx = {f"rel{r}": r for r in range(num_rels)}
        key = jax.random.PRNGKey(0) if key is None else key
        self.params = []
        for r in range(num_rels):
            D = num_args_per_rel[r] * latent_dim
            key, kw, kv, kb, ku = jax.random.split(key, 5)
            scale = 1.0 / jnp.sqrt(D)
            W = jax.random.uniform(kw, (slice_dim, D, D), jnp.float32, -scale, scale)   # nn.Bilinear weight
            V = jax.random.uniform(kv, (slice_dim, D), jnp.float32, -scale, scale)      # nn.Linear weight
            b = jax.random.uniform(kb, (slice_dim,), jnp.float32, -scale, scale)        # nn.Linear bias
            u = jax.random.uniform(ku, (slice_dim, 1), jnp.float32,
                                   -1.0 / jnp.sqrt(slice_dim), 1.0 / jnp.sqrt(slice_dim))  # params_u_R
            # Kernel layouts: Wt[s*D+e, d] = W[s, d, e]; fuse [Wt ; V] into one weight slab,
            # pack bias and u into one (S, 2) column block.
            Wt = jnp.transpose(W, (0, 2, 1)).reshape(slice_dim * D, D)
            A = jnp.concatenate([Wt, V], axis=0)                           # [S*D + S, D]
            bu = jnp.concatenate([b.reshape(slice_dim, 1), u], axis=1)     # [S, 2]
            self.params.append(dict(W=W, V=V, b=b, u=u, A=A, bu=bu))

    def forward(self, latent_vars, node_embeds, max_tile_n=512):
        """fast_inference_mode: latent_vars is a list of (pred_name, pair_index_array [N,2])."""
        scores = []
        for pred_name, pred_sample in latent_vars:
            prm = self.params[self.rel2idx[pred_name]]
            pairs = jnp.asarray(pred_sample, dtype=jnp.int32)
            scores.append(_score_pairs(node_embeds, pairs, prm["A"], prm["bu"],
                                       max_tile_n=max_tile_n))
        return scores

    # TODO(synk): fast_mode / batch_mode / load_method==0 branches reuse the same scoring
    # kernel; the surrounding python-list masking & BCE loss bookkeeping stays in plain JAX.


if __name__ == "__main__":
    key = jax.random.PRNGKey(0)
    num_entities, latent_dim, slice_dim, num_rels = 32, 16, 5, 2
    n_samples = 16  # per relation

    k_emb, k_pairs0, k_pairs1 = jax.random.split(key, 3)
    node_embeds = jax.random.normal(k_emb, (num_entities, latent_dim), jnp.float32)

    model = FactorizedPosteriorPallas(
        num_rels=num_rels, latent_dim=latent_dim,
        num_args_per_rel=[2] * num_rels, slice_dim=slice_dim)

    latent_vars = [
        ("rel0", jax.random.randint(k_pairs0, (n_samples, 2), 0, num_entities)),
        ("rel1", jax.random.randint(k_pairs1, (n_samples, 2), 0, num_entities)),
    ]

    probs = model.forward(latent_vars, node_embeds)
    probs = [jax.block_until_ready(p) for p in probs]

    # sanity check against a pure-JAX reference of the same math
    for (pred_name, pairs), p in zip(latent_vars, probs):
        prm = model.params[model.rel2idx[pred_name]]
        pairs = jnp.asarray(pairs, dtype=jnp.int32)
        q = jnp.concatenate([node_embeds[pairs[:, 0]], node_embeds[pairs[:, 1]]], axis=1)
        ref = _ref_probs(q, prm["W"], prm["V"], prm["b"], prm["u"])
        assert p.shape == (n_samples,)
        assert jnp.allclose(p, ref, atol=1e-4, rtol=1e-4), (p, ref)

    print("KERNEL_OK")
</pallas_src>

<mosaic_0001>
module attributes {stable_mosaic.version = 11 : i64} {
  func.func @_score_kernel(%arg0: i32, %arg1: memref<32x128xf32, #tpu.memory_space<vmem>>, %arg2: memref<165x32xf32, #tpu.memory_space<vmem>>, %arg3: memref<5x2xf32, #tpu.memory_space<vmem>>, %arg4: memref<1x128xf32, #tpu.memory_space<vmem>>) attributes {dimension_semantics = [#tpu.dimension_semantics<parallel>], iteration_bounds = array<i64: 1>, scalar_prefetch = 0 : i64, scratch_operands = 0 : i64, tpu.core_type = #tpu.core_type<tc>, window_params = [{transform_indices = @transform_0, window_bounds = array<i64: 32, 128>}, {pipeline_mode = #tpu.pipeline_mode<synchronous>, transform_indices = @transform_1, window_bounds = array<i64: 165, 32>}, {pipeline_mode = #tpu.pipeline_mode<synchronous>, transform_indices = @transform_2, window_bounds = array<i64: 5, 2>}, {transform_indices = @transform_3, window_bounds = array<i64: 1, 128>}]} {
    %c0 = arith.constant 0 : index
    %c0_0 = arith.constant 0 : index
    %0 = vector.load %arg1[%c0, %c0_0] : memref<32x128xf32, #tpu.memory_space<vmem>>, vector<32x128xf32>
    %c0_1 = arith.constant 0 : index
    %c0_2 = arith.constant 0 : index
    %1 = vector.load %arg2[%c0_1, %c0_2] : memref<165x32xf32, #tpu.memory_space<vmem>>, vector<165x32xf32>
    %cst = arith.constant dense<0.000000e+00> : vector<165x128xf32>
    %2 = tpu.matmul %1, %0, %cst {dimension_numbers = #tpu.dot_dimension_numbers<[1], [0], [0], [1], [0, 0, 1, 1], [], []>} : vector<165x32xf32>, vector<32x128xf32>, vector<165x128xf32> -> vector<165x128xf32>
    %3 = vector.extract_strided_slice %2 {offsets = [0, 0], sizes = [160, 128], strides = [1, 1]} : vector<165x128xf32> to vector<160x128xf32>
    %4 = vector.shape_cast %3 : vector<160x128xf32> to vector<5x32x128xf32>
    %5 = vector.extract_strided_slice %2 {offsets = [160, 0], sizes = [5, 128], strides = [1, 1]} : vector<165x128xf32> to vector<5x128xf32>
    %6 = vector.shape_cast %0 : vector<32x128xf32> to vector<1x32x128xf32>
    %7 = vector.broadcast %6 : vector<1x32x128xf32> to vector<5x32x128xf32>
    %8 = arith.mulf %4, %7 : vector<5x32x128xf32>
    %cst_3 = arith.constant dense<0.000000e+00> : vector<5x128xf32>
    %9 = vector.multi_reduction <add>, %8, %cst_3 [1] : vector<5x32x128xf32> to vector<5x128xf32>
    %10 = arith.addf %9, %5 : vector<5x128xf32>
    %c0_4 = arith.constant 0 : index
    %c0_5 = arith.constant 0 : index
    %11 = vector.load %arg3[%c0_4, %c0_5] : memref<5x2xf32, #tpu.memory_space<vmem>>, vector<5x1xf32>
    %12 = vector.broadcast %11 : vector<5x1xf32> to vector<5x128xf32>
    %13 = arith.addf %10, %12 : vector<5x128xf32>
    %14 = math.tanh %13 : vector<5x128xf32>
    %c0_6 = arith.constant 0 : index
    %c1 = arith.constant 1 : index
    %15 = vector.load %arg3[%c0_6, %c1] : memref<5x2xf32, #tpu.memory_space<vmem>>, vector<5x1xf32>
    %16 = vector.broadcast %15 : vector<5x1xf32> to vector<5x128xf32>
    %17 = arith.mulf %14, %16 : vector<5x128xf32>
    %cst_7 = arith.constant dense<0.000000e+00> : vector<128xf32>
    %18 = vector.multi_reduction <add>, %17, %cst_7 [0] : vector<5x128xf32> to vector<128xf32>
    %19 = vector.shape_cast %18 : vector<128xf32> to vector<1x128xf32>
    %20 = arith.negf %19 : vector<1x128xf32>
    %21 = math.exp %20 : vector<1x128xf32>
    %cst_8 = arith.constant 1.000000e+00 : f32
    %22 = vector.broadcast %cst_8 : f32 to vector<1x128xf32>
    %23 = arith.addf %22, %21 : vector<1x128xf32>
    %24 = arith.divf %22, %23 : vector<1x128xf32>
    %c0_9 = arith.constant 0 : index
    %c0_10 = arith.constant 0 : index
    %25 = vector.load %arg4[%c0_9, %c0_10] : memref<1x128xf32, #tpu.memory_space<vmem>>, vector<1x128xf32>
    tpu.vector_store %arg4[%c0_9, %c0_10], %24 {strides = array<i32>} : memref<1x128xf32, #tpu.memory_space<vmem>>, vector<1x128xf32>,
    return
  }
  func.func @transform_0(%arg0: i32) -> (i32, i32) {
    %c0_i32 = arith.constant 0 : i32
    %c0_i32_0 = arith.constant 0 : i32
    return %c0_i32, %arg0 : i32, i32
  }
  func.func @transform_1(%arg0: i32) -> (i32, i32) {
    %c0_i32 = arith.constant 0 : i32
    %c0_i32_0 = arith.constant 0 : i32
    %c0_i32_1 = arith.constant 0 : i32
    return %c0_i32, %c0_i32_0 : i32, i32
  }
  func.func @transform_2(%arg0: i32) -> (i32, i32) {
    %c0_i32 = arith.constant 0 : i32
    %c0_i32_0 = arith.constant 0 : i32
    %c0_i32_1 = arith.constant 0 : i32
    return %c0_i32, %c0_i32_0 : i32, i32
  }
  func.func @transform_3(%arg0: i32) -> (i32, i32) {
    %c0_i32 = arith.constant 0 : i32
    %c0_i32_0 = arith.constant 0 : i32
    return %c0_i32, %arg0 : i32, i32
  }
}

</mosaic_0001>

<bundles_post_ra>
// kernel: _score_pairs.1
= control target key start
LH: loop header
LB: loop body
LE: loop exit
PB: predicated region body
PF: predicated region fallthrough
CT: control target
= control target key end

     0   :  { %v577_v0 = vmov 0.0   ;;  %vm39_vm0 = vcmask 261120   ;;  %vm578_vm1 = vmmov 0   ;;  %v579_v10 = vmov 0   ;;  %s792_s0 = inlined_call_operand.vmem [shape: f32[32,128], index: 0, kind: input, shape index: {}]   ;;  %s793_s1 = inlined_call_operand.vmem [shape: f32[165,32], index: 1, kind: input, shape index: {}]   ;;  %s794_s2 = inlined_call_operand.vmem [shape: f32[5,2], index: 2, kind: input, shape index: {}]   ;;  %s795_s3 = inlined_call_operand.vmem [shape: f32[1,128], index: 3, kind: output, shape index: {}]  }
   0x1   :  { %478 = vmatprep.subr.mxu0 %v577_v0  ;;  %549 = vmatprep.subr.mxu1 %v577_v0  ;;  %v606_v1 = vld [vmem:[%s792_s0 + $0x18] sm:$0xff]  ;;  %v611_v2 = vld [vmem:[%s792_s0 + $0x10] sm:$0xff]  ;;  %v620_v3 = vld [vmem:[%s792_s0 + $0x8] sm:$0xff]  ;;  %v580_v13 = vmov 1   ;;  %vm400_vm2 = vcmask 1041409   ;;  %vm403_vm3 = vcmask 1042434  }
   0x2   :  { %479 = vmatpush3.msra.mxu0 %v606_v1  ;;  %553 = vmatpush3.msra.mxu1 %v606_v1  ;;  %v629_v4 = vld [vmem:[%s792_s0] sm:$0xff]  ;;  %v29_v6 = vld [vmem:[%s793_s1 + $0x58] sm:$0xff]  ;;  %v19_v8 = vld [vmem:[%s793_s1 + $0x8] sm:$0xff]  ;;  %vm406_vm4 = vcmask 1043459   ;;  %vm409_vm5 = vcmask 1044484   ;;  %vm412_vm6 = vcmask 1044480  }
   0x3   :  { %480 = vmatprep.subr.mxu0 %v577_v0  ;;  %550 = vmatprep.subr.mxu1 %v577_v0  ;;  %v18_v5 = vld [vmem:[%s793_s1] sm:$0xff]  ;;  %v20_v11 = vld [vmem:[%s793_s1 + $0x10] sm:$0xff]  ;;  %v31_v12 = vld [vmem:[%s793_s1 + $0x68] sm:$0xff] }
   0x4   :  { %481 = vmatpush3.msra.mxu0 %v611_v2  ;;  %554 = vmatpush3.msra.mxu1 %v611_v2  ;;  %v353_v7 = vld [vmem:[%s794_s2] sm:$0x1f]  ;;  %v21_v14 = vld [vmem:[%s793_s1 + $0x18] sm:$0xff]  ;;  %v32_v15 = vld [vmem:[%s793_s1 + $0x70] sm:$0xff] }
   0x5   :  { %482 = vmatprep.subr.mxu0 %v577_v0  ;;  %551 = vmatprep.subr.mxu1 %v577_v0  ;;  %v30_v9 = vld [vmem:[%s793_s1 + $0x60] sm:$0xff]  ;;  %v33_v17 = vld [vmem:[%s793_s1 + $0x78] sm:$0xff]  ;;  %v23_v18 = vld [vmem:[%s793_s1 + $0x28] sm:$0xff] }
   0x6   :  { %483 = vmatpush3.msra.mxu0 %v620_v3  ;;  %555 = vmatpush3.msra.mxu1 %v620_v3  ;;  %v22_v16 = vld [vmem:[%s793_s1 + $0x20] sm:$0xff]  ;;  %v24_v20 = vld [vmem:[%s793_s1 + $0x30] sm:$0xff]  ;;  %v35_v21 = vld [vmem:[%s793_s1 + $0x88] sm:$0xff] }
   0x7   :  { %484 = vmatprep.subr.mxu0 %v577_v0  ;;  %552 = vmatprep.subr.mxu1 %v577_v0  ;;  %v34_v19 = vld [vmem:[%s793_s1 + $0x80] sm:$0xff]  ;;  %v25_v22 = vld [vmem:[%s793_s1 + $0x38] sm:$0xff]  ;;  %v36_v23 = vld [vmem:[%s793_s1 + $0x90] sm:$0xff] }
   0x8   :  { %485 = vmatpush3.msra.mxu0 %v629_v4  ;;  %556 = vmatpush3.msra.mxu1 %v629_v4  ;;  %v26_v24 = vld [vmem:[%s793_s1 + $0x40] sm:$0xff]  ;;  %v37_v25 = vld [vmem:[%s793_s1 + $0x98] sm:$0xff]  ;;  %v27_v26 = vld [vmem:[%s793_s1 + $0x48] sm:$0xff] }
   0x9   :  { %486 = vmatprep.mubr.msk.f32.mxu0 %vm578_vm1, %v577_v0  ;;  %519 = vmatprep.mubr.msk.f32.mxu1 %vm578_vm1, %v577_v0  ;;  %v38_v27 = vld [vmem:[%s793_s1 + $0xa0] sm:$0x1f]  ;;  %v28_v28 = vld [vmem:[%s793_s1 + $0x50] sm:$0xff] }
   0xa   :  { %487 = vmatmul.mubr.msk.f32.vlgmr.msra.gmra.mxu0 %vm39_vm0, %v18_v5  ;;  %520 = vmatmul.mubr.msk.f32.vlgmr.msra.gmra.mxu1 %vm39_vm0, %v29_v6 }
   0xb   :  { %489 = vmatprep.mubr.msk.f32.mxu0 %vm578_vm1, %v577_v0  ;;  %522 = vmatprep.mubr.msk.f32.mxu1 %vm578_vm1, %v577_v0 }
   0xc   :  { %561 = vset.pattern.permute.xlu0 %v579_v10 }
   0xd   :  { %356 = vperm.xlu0 %561, %v353_v7  }
   0xe   :  { %490 = vmatmul.mubr.msk.f32.gmra.mxu0 %vm39_vm0, %v19_v8  ;;  %523 = vmatmul.mubr.msk.f32.gmra.mxu1 %vm39_vm0, %v30_v9 }
   0xf   :  { %492 = vmatprep.mubr.msk.f32.mxu0 %vm578_vm1, %v577_v0  ;;  %525 = vmatprep.mubr.msk.f32.mxu1 %vm578_vm1, %v577_v0 }
  0x11   :  { %562 = vset.pattern.permute.xlu0 %v580_v13 }
  0x12   :  { %493 = vmatmul.mubr.msk.f32.gmra.mxu0 %vm39_vm0, %v20_v11  ;;  %526 = vmatmul.mubr.msk.f32.gmra.mxu1 %vm39_vm0, %v31_v12 }
  0x13   :  { %495 = vmatprep.mubr.msk.f32.mxu0 %vm578_vm1, %v577_v0  ;;  %528 = vmatprep.mubr.msk.f32.mxu1 %vm578_vm1, %v577_v0 }
  0x14   :  { %378 = vperm.xlu0 %562, %v353_v7  }
  0x16   :  { %496 = vmatmul.mubr.msk.f32.gmra.mxu0 %vm39_vm0, %v21_v14  ;;  %529 = vmatmul.mubr.msk.f32.gmra.mxu1 %vm39_vm0, %v32_v15 }
  0x17   :  { %498 = vmatprep.mubr.msk.f32.mxu0 %vm578_vm1, %v577_v0  ;;  %531 = vmatprep.mubr.msk.f32.mxu1 %vm578_vm1, %v577_v0 }
  0x1a   :  { %499 = vmatmul.mubr.msk.f32.gmra.mxu0 %vm39_vm0, %v22_v16  ;;  %532 = vmatmul.mubr.msk.f32.gmra.mxu1 %vm39_vm0, %v33_v17 }
  0x1b   :  { %501 = vmatprep.mubr.msk.f32.mxu0 %vm578_vm1, %v577_v0  ;;  %534 = vmatprep.mubr.msk.f32.mxu1 %vm578_vm1, %v577_v0 }
  0x1e   :  { %502 = vmatmul.mubr.msk.f32.gmra.mxu0 %vm39_vm0, %v23_v18  ;;  %535 = vmatmul.mubr.msk.f32.gmra.mxu1 %vm39_vm0, %v34_v19 }
  0x1f   :  { %504 = vmatprep.mubr.msk.f32.mxu0 %vm578_vm1, %v577_v0  ;;  %537 = vmatprep.mubr.msk.f32.mxu1 %vm578_vm1, %v577_v0 }
  0x22   :  { %505 = vmatmul.mubr.msk.f32.gmra.mxu0 %vm39_vm0, %v24_v20  ;;  %538 = vmatmul.mubr.msk.f32.gmra.mxu1 %vm39_vm0, %v35_v21 }
  0x23   :  { %507 = vmatprep.mubr.msk.f32.mxu0 %vm578_vm1, %v577_v0  ;;  %540 = vmatprep.mubr.msk.f32.mxu1 %vm578_vm1, %v577_v0 }
  0x26   :  { %508 = vmatmul.mubr.msk.f32.gmra.mxu0 %vm39_vm0, %v25_v22  ;;  %541 = vmatmul.mubr.msk.f32.gmra.mxu1 %vm39_vm0, %v36_v23 }
  0x27   :  { %510 = vmatprep.mubr.msk.f32.mxu0 %vm578_vm1, %v577_v0  ;;  %543 = vmatprep.mubr.msk.f32.mxu1 %vm578_vm1, %v577_v0 }
  0x2a   :  { %511 = vmatmul.mubr.msk.f32.gmra.mxu0 %vm39_vm0, %v26_v24  ;;  %544 = vmatmul.mubr.msk.f32.gmra.mxu1 %vm39_vm0, %v37_v25 }
  0x2b   :  { %513 = vmatprep.mubr.msk.f32.mxu0 %vm578_vm1, %v577_v0  ;;  %546 = vmatprep.mubr.msk.f32.mxu1 %vm578_vm1, %v577_v0 }
  0x2e   :  { %514 = vmatmul.mubr.msk.f32.gmra.mxu0 %vm39_vm0, %v27_v26  ;;  %547 = vmatmul.mubr.msk.f32.gmra.mxu1 %vm39_vm0, %v38_v27 }
  0x2f   :  { %516 = vmatprep.mubr.msk.f32.mxu0 %vm578_vm1, %v577_v0 }
  0x32   :  { %517 = vmatmul.mubr.msk.f32.gmra.mxu0 %vm39_vm0, %v28_v28 }
  0xca   :  { %v169_v29 = vpop.f32.mrf.mxu0  ;;  %v766_v30 = vpop.f32.mrf.mxu1 }
  0xcb   :  { %v273_v56 = vmul.f32 %v169_v29, %v629_v4 }
  0xcc   :  { %v488_v31 = vpop.f32.mrf.mxu0  ;;  %v521_v32 = vpop.f32.mrf.mxu1 }
  0xce   :  { %v174_v33 = vpop.f32.mrf.mxu0  ;;  %v229_v34 = vpop.f32.mrf.mxu1 }
  0xcf   :  { %v285_v43 = vmul.f32 %v229_v34, %v629_v4  ;;  %v274_v53 = vmul.f32 %v174_v33, %v620_v3 }
  0xd0   :  { %v491_v35 = vpop.f32.mrf.mxu0  ;;  %v524_v36 = vpop.f32.mrf.mxu1 }
  0xd1   :  { %v293_v0 = vadd.f32 %v274_v53, %v273_v56 }
  0xd2   :  { %v179_v37 = vpop.f32.mrf.mxu0  ;;  %v234_v38 = vpop.f32.mrf.mxu1 }
  0xd3   :  { %v286_v44 = vmul.f32 %v234_v38, %v620_v3  ;;  %v275_v57 = vmul.f32 %v179_v37, %v611_v2 }
  0xd4   :  { %v494_v39 = vpop.f32.mrf.mxu0  ;;  %v527_v40 = vpop.f32.mrf.mxu1 }
  0xd5   :  { %v320_v49 = vadd.f32 %v286_v44, %v285_v43  ;;  %v294_v11 = vadd.f32 %v293_v0, %v275_v57 }
  0xd6   :  { %v184_v41 = vpop.f32.mrf.mxu0  ;;  %v239_v42 = vpop.f32.mrf.mxu1 }
  0xd7   :  { %v287_v50 = vmul.f32 %v239_v42, %v611_v2  ;;  %v276_v5 = vmul.f32 %v184_v41, %v606_v1 }
  0xd8   :  { %v497_v45 = vpop.f32.mrf.mxu0  ;;  %v530_v46 = vpop.f32.mrf.mxu1 }
  0xd9   :  { %v321_v58 = vadd.f32 %v320_v49, %v287_v50  ;;  %v295_v17 = vadd.f32 %v294_v11, %v276_v5 }
  0xda   :  { %v189_v47 = vpop.f32.mrf.mxu0  ;;  %v244_v48 = vpop.f32.mrf.mxu1 }
  0xdb   :  { %v288_v59 = vmul.f32 %v244_v48, %v606_v1  ;;  %v277_v8 = vmul.f32 %v189_v47, %v629_v4  ;;  %v296_v28 = vrot.slane %v295_v17, 4 }
  0xdc   :  { %v500_v51 = vpop.f32.mrf.mxu0  ;;  %v533_v52 = vpop.f32.mrf.mxu1 }
  0xdd   :  { %v322_v12 = vadd.f32 %v321_v58, %v288_v59  ;;  %v297_v39 = vadd.f32 %v296_v28, %v295_v17  ;;  %v284_v59 = vmul.f32 %v766_v30, %v606_v1 }
  0xde   :  { %v194_v54 = vpop.f32.mrf.mxu0  ;;  %v249_v55 = vpop.f32.mrf.mxu1 }
  0xdf   :  { %v278_v62 = vmul.f32 %v194_v54, %v620_v3  ;;  %v289_v63 = vmul.f32 %v249_v55, %v629_v4  ;;  %v323_v23 = vrot.slane %v322_v12, 4  ;;  %v298_v51 = vrot.slane %v297_v39, 2 }
  0xe0   :  { %v503_v60 = vpop.f32.mrf.mxu0  ;;  %v536_v61 = vpop.f32.mrf.mxu1 }
  0xe1   :  { %v302_v15 = vadd.f32 %v278_v62, %v277_v8  ;;  %v324_v34 = vadd.f32 %v323_v23, %v322_v12  ;;  %v299_v61 = vadd.f32 %v298_v51, %v297_v39 }
  0xe2   :  { %v199_v6 = vpop.f32.mrf.mxu0  ;;  %v254_v7 = vpop.f32.mrf.mxu1 }
  0xe3   :  { %v279_v9 = vmul.f32 %v199_v6, %v611_v2  ;;  %v290_v10 = vmul.f32 %v254_v7, %v620_v3  ;;  %v325_v45 = vrot.slane %v324_v34, 2  ;;  %v357_v6 = vpop.permute.xlu0 %356  ;;  %v300_v8 = vrot.slane %v299_v61, 1 }
  0xe4   :  { %v506_v13 = vpop.f32.mrf.mxu0  ;;  %v539_v14 = vpop.f32.mrf.mxu1  ;;  %v358_v11 = vrot.slane %v357_v6, 1 }
  0xe5   :  { %v329_v16 = vadd.f32 %v290_v10, %v289_v63  ;;  %v303_v20 = vadd.f32 %v302_v15, %v279_v9  ;;  %v326_v57 = vadd.f32 %v325_v45, %v324_v34 }
  0xe6   :  { %v204_v18 = vpop.f32.mrf.mxu0  ;;  %v259_v19 = vpop.f32.mrf.mxu1 }
  0xe7   :  { %v280_v21 = vmul.f32 %v204_v18, %v606_v1  ;;  %v291_v22 = vmul.f32 %v259_v19, %v611_v2  ;;  %v327_v5 = vrot.slane %v326_v57, 1  ;;  %v361_v19 = vrot.slane %v357_v6, 4 }
  0xe8   :  { %v509_v24 = vpop.f32.mrf.mxu0  ;;  %v542_v25 = vpop.f32.mrf.mxu1 }
  0xe9   :  { %v304_v26 = vadd.f32 %v303_v20, %v280_v21  ;;  %v330_v27 = vadd.f32 %v329_v16, %v291_v22  ;;  %v328_v14 = vadd.f32 %v327_v5, %v326_v57  ;;  %v360_v16 = vrot.slane %v357_v6, 3 }
  0xea   :  { %v209_v29 = vpop.f32.mrf.mxu0  ;;  %v264_v31 = vpop.f32.mrf.mxu1  ;;  %v359_v25 = vrot.slane %v357_v6, 2 }
  0xeb   :  { %v305_v32 = vrot.slane %v304_v26, 4  ;;  %v292_v33 = vmul.f32 %v264_v31, %v606_v1  ;;  %v281_v49 = vmul.f32 %v209_v29, %v629_v4  ;;  %v301_v1 = vadd.f32 %v300_v8, %v299_v61 }
  0xec   :  { %v512_v35 = vpop.f32.mrf.mxu0  ;;  %v545_v36 = vpop.f32.mrf.mxu1 }
  0xed   :  { %v306_v37 = vadd.f32 %v305_v32, %v304_v26  ;;  %v331_v38 = vadd.f32 %v330_v27, %v292_v33  ;;  %v379_v32 = vpop.permute.xlu0 %378 }
  0xee   :  { %v214_v40 = vpop.f32.mrf.mxu0  ;;  %v269_v41 = vpop.f32.mrf.mxu1  ;;  %v380_v33 = vrot.slane %v379_v32, 1  ;;  %v382_v35 = vrot.slane %v379_v32, 3  ;;  %v383_v39 = vrot.slane %v379_v32, 4 }
  0xef   :  { %v307_v42 = vrot.slane %v306_v37, 2  ;;  %v332_v43 = vrot.slane %v331_v38, 4  ;;  %v282_v44 = vmul.f32 %v214_v40, %v620_v3  ;;  %v339_v63 = vrot.slane %v269_v41, 1 }
  0xf0   :  { %v515_v46 = vpop.f32.mrf.mxu0  ;;  %v548_v47 = vpop.f32.mrf.mxu1  ;;  %v341_v9 = vrot.slane %v269_v41, 3  ;;  %v342_v12 = vrot.slane %v269_v41, 4  ;;  %v348_v21 = vadd.f32 %v301_v1, %v269_v41  ;;  %v340_v22 = vrot.slane %v269_v41, 2 }
  0xf1   :  { %v308_v48 = vadd.f32 %v307_v42, %v306_v37  ;;  %v333_v50 = vadd.f32 %v332_v43, %v331_v38  ;;  %v311_v55 = vadd.f32 %v282_v44, %v281_v49  ;;  %v381_v38 = vrot.slane %v379_v32, 2 }
  0xf2   :  { %v219_v52 = vpop.f32.mrf.mxu0  ;;  %v351_v30 = vadd.f32 %v341_v9, %v328_v14  ;;  %v367_v28 = vadd.f32 %v357_v6, %v348_v21 }
  0xf3   :  { %v309_v53 = vrot.slane %v308_v48, 1  ;;  %v334_v54 = vrot.slane %v333_v50, 2  ;;  %v283_v56 = vmul.f32 %v219_v52, %v611_v2 }
  0xf4   :  { %v518_v58 = vpop.f32.mrf.mxu0  ;;  %v370_v24 = vadd.f32 %v360_v16, %v351_v30 }
  0xf5   :  { %v335_v3 = vadd.f32 %v334_v54, %v333_v50  ;;  %v312_v60 = vadd.f32 %v311_v55, %v283_v56  ;;  %v310_v62 = vadd.f32 %v309_v53, %v308_v48 }
  0xf7   :  { %v336_v0 = vrot.slane %v335_v3, 1  ;;  %v313_v4 = vadd.f32 %v312_v60, %v284_v59  ;;  %v349_v10 = vadd.f32 %v339_v63, %v310_v62 }
  0xf9   :  { %v314_v7 = vrot.slane %v313_v4, 4  ;;  %v337_v2 = vadd.f32 %v336_v0, %v335_v3  ;;  %v368_v17 = vadd.f32 %v358_v11, %v349_v10 }
  0xfb   :  { %v315_v13 = vadd.f32 %v314_v7, %v313_v4  ;;  %v352_v18 = vadd.f32 %v342_v12, %v337_v2  ;;  %563 = vtanh.f32 %v368_v17 }
  0xfc   :  { %565 = vtanh.f32 %v370_v24 }
  0xfd   :  { %v316_v15 = vrot.slane %v315_v13, 2  ;;  %v371_v26 = vadd.f32 %v361_v19, %v352_v18 }
  0xff   :  { %v317_v20 = vadd.f32 %v316_v15, %v315_v13  ;;  %567 = vtanh.f32 %v371_v26 }
 0x100   :  { %569 = vtanh.f32 %v367_v28 }
 0x101   :  { %v318_v23 = vrot.slane %v317_v20, 1 }
 0x103   :  { %v319_v27 = vadd.f32 %v318_v23, %v317_v20 }
 0x105   :  { %v350_v29 = vadd.f32 %v340_v22, %v319_v27 }
 0x107   :  { %v369_v31 = vadd.f32 %v359_v25, %v350_v29 }
 0x108   :  { %v564_v34 = vpop.eup %563 }
 0x109   :  { %571 = vtanh.f32 %v369_v31  ;;  %v390_v36 = vmul.f32 %v564_v34, %v380_v33  ;;  %v566_v37 = vpop.eup %565 }
 0x10a   :  { %v392_v43 = vmul.f32 %v566_v37, %v382_v35 }
 0x10b   :  { %v399_v44 = vrot.slane %v390_v36, 7 }
 0x10c   :  { %v568_v40 = vpop.eup %567  ;;  %v405_v50 = vrot.slane %v392_v43, 5 }
 0x10d   :  { %v570_v41 = vpop.eup %569  ;;  %v393_v46 = vmul.f32 %v568_v40, %v383_v39 }
 0x10e   :  { %v389_v47 = vmul.f32 %v570_v41, %v379_v32 }
 0x10f   :  { %v408_v52 = vrot.slane %v393_v46, 4 }
 0x110   :  { %v401_v49 = vsel %vm400_vm2, %v399_v44, %v389_v47 }
 0x116   :  { %v572_v42 = vpop.eup %571 }
 0x117   :  { %v391_v45 = vmul.f32 %v572_v42, %v381_v38 }
 0x119   :  { %v402_v48 = vrot.slane %v391_v45, 6 }
 0x11b   :  { %v404_v51 = vsel %vm403_vm3, %v402_v48, %v401_v49 }
 0x11c   :  { %v407_v53 = vsel %vm406_vm4, %v405_v50, %v404_v51 }
 0x11d   :  { %v410_v54 = vsel %vm409_vm5, %v408_v52, %v407_v53 }
 0x11e   :  { %v413_v55 = vsel %vm412_vm6, %v410_v54, 0.0 }
 0x11f   :  { %v414_v56 = vrot.slane %v413_v55, 4 }
 0x121   :  { %v415_v57 = vadd.f32 %v414_v56, %v413_v55 }
 0x123   :  { %v416_v58 = vrot.slane %v415_v57, 2 }
 0x125   :  { %v417_v59 = vadd.f32 %v416_v58, %v415_v57 }
 0x127   :  { %v418_v3 = vrot.slane %v417_v59, 1 }
 0x129   :  { %v419_v60 = vadd.f32 %v418_v3, %v417_v59 }
 0x12b   :  { %v452_v61 = vmul.f32 -1.442695, %v419_v60 }
 0x12d   :  { %573 = vpow2.f32 %v452_v61 }
 0x13a   :  { %v574_v62 = vpop.eup %573 }
 0x13b   :  { %v423_v63 = vadd.f32 1.0, %v574_v62 }
 0x13d   :  { %575 = vrcp.f32 %v423_v63 }
 0x14a   :  { %v576_v0 = vpop.eup %575 }
 0x14b   :  { %426 = vst [vmem:[%s795_s3] sm:$0x1] %v576_v0 }

</bundles_post_ra>
